<compile_context>
chip_gen: v6e
topology: v6e:2x2x1
jax: 0.10.0
libtpu: 0.0.40
codegen_flags: <defaults>
</compile_context>

<pallas_src>
import jax
import jax.numpy as jnp
from jax.experimental import pallas as pl
from jax.experimental.pallas import tpu as pltpu


def _attention_kernel(h_ref, e_ref, wht_ref, webd_ref, b_ref, vsel_ref, out_ref):
    # h_ref   : [TM, Hm]        hidden rows                     (compute dtype)
    # e_ref   : [TM, S*Hi]      encoder rows, lane-dense        (compute dtype)
    # wht_ref : [Hm, S*O]       hidden weight, lane-tiled S times
    # webd_ref: [S*Hi, S*O]     encoder weight, block-diagonal
    # b_ref   : [1, S*O]        bias, tiled S times (f32)
    # vsel_ref: [S*O, S]        block-diagonal v selector (f32)
    # out_ref : [TM, S]         softmax attention weights

    # Hidden term, already replicated across S by the lane-tiled weight.
    hid = jnp.dot(h_ref[...], wht_ref[...],
                  preferred_element_type=jnp.float32)            # [TM, S*O]
    # Encoder term: block-diagonal weight keeps everything 2-D and lane-dense.
    enc = jnp.dot(e_ref[...], webd_ref[...],
                  preferred_element_type=jnp.float32)            # [TM, S*O]

    energy = jnp.tanh(enc + hid + b_ref[...].astype(jnp.float32))  # [TM, S*O]

    # v projection + per-S reduction as one matmul with the block-diag selector.
    scores = jnp.dot(energy, vsel_ref[...].astype(jnp.float32),
                     preferred_element_type=jnp.float32)         # [TM, S]

    # Numerically-stable softmax over S with an EXACT normalizer
    # (approx reciprocal broke the rows-sum-to-1 invariant).
    m = jnp.max(scores, axis=-1, keepdims=True)
    ex = jnp.exp(scores - m)
    denom = jnp.sum(ex, axis=-1, keepdims=True)
    out_ref[...] = (ex / denom).astype(out_ref.dtype)


def _pad128(n):
    return ((int(n) + 127) // 128) * 128


def _pick_row_block(n_rows, s, hi, hm, o, in_bytes, out_bytes):
    """Largest row tile that fits a ~10 MiB lane-padded VMEM budget.

    Per-row footprint (lane dims padded to 128, inputs/outputs double-buffered,
    f32 [row, S*O] intermediates).  10 MiB sits well under the 16 MiB scoped
    VMEM default of v5e; v6e/v7x have more headroom.  Only cap so the grid
    keeps >= ~4 steps (DMA/compute overlap + both v7x TensorCores).
    """
    per_row = (2 * _pad128(s * hi) * in_bytes      # encoder tile
               + 2 * _pad128(hm) * in_bytes        # hidden tile
               + 2 * _pad128(s) * out_bytes        # output tile
               + 4 * _pad128(s * o) * 4)           # f32 intermediates
    budget = 10 << 20
    vmem_cap = max(8, budget // max(per_row, 1))
    min_steps_cap = max(8, -(-n_rows // 4))        # aim for >= ~4 grid steps
    tm = min(vmem_cap, min_steps_cap, 4096)
    return max(8, (tm // 8) * 8)


def attention_forward(hidden, encoder_outputs, w_attn, b_attn, w_v, *,
                      row_block=None, compute_dtype=None):
    """hidden: [B, T, Hm]; encoder_outputs: [B, T, S, Hi];
    w_attn: [O, Hm+Hi] (torch nn.Linear layout), b_attn: [O], w_v: [1, O].
    compute_dtype: optional cast for hidden/encoder/matmul weights
    (jnp.bfloat16 recommended on v6e/v7x); accumulation/softmax stay f32.
    Returns softmax attention weights: [B, T, S]."""
    B, T, Hm = hidden.shape
    _, _, S, Hi = encoder_outputs.shape
    O = w_attn.shape[0]
    N = B * T
    out_dtype = hidden.dtype

    cdt = jnp.dtype(compute_dtype) if compute_dtype is not None else jnp.dtype(hidden.dtype)
    in_bytes = cdt.itemsize
    out_bytes = jnp.dtype(out_dtype).itemsize

    if row_block is None:
        tm = _pick_row_block(N, S, Hi, Hm, O, in_bytes, out_bytes)
    else:
        tm = max(8, (int(row_block) // 8) * 8)
    n_blocks = pl.cdiv(N, tm)
    n_pad = n_blocks * tm

    # torch computes x @ W^T + b with x = cat((hidden, encoder), -1),
    # so rows 0:Hm of W^T act on hidden and rows Hm: act on the encoder.
    w_t = jnp.transpose(w_attn)                     # [Hm+Hi, O]
    wh = w_t[:Hm, :]                                # [Hm, O]
    we = w_t[Hm:, :]                                # [Hi, O]

    # Lane-dense expansions (tiny weights; built once in the wrapper).
    wh_tiled = jnp.tile(wh, (1, S)).astype(cdt)                              # [Hm, S*O]
    webd = jnp.kron(jnp.eye(S, dtype=we.dtype), we).astype(cdt)              # [S*Hi, S*O]
    b_tiled = jnp.tile(b_attn.reshape(1, O), (1, S)).astype(jnp.float32)     # [1, S*O]
    vsel = jnp.kron(jnp.eye(S, dtype=w_v.dtype),
                    w_v.reshape(O, 1)).astype(jnp.float32)                   # [S*O, S]

    h_flat = hidden.reshape(N, Hm).astype(cdt)
    e_flat = encoder_outputs.reshape(N, S * Hi).astype(cdt)   # free, lane-dense view
    if n_pad != N:
        # Ragged B*T: zero-pad rows (padded rows give finite, discarded values).
        h_flat = jnp.pad(h_flat, ((0, n_pad - N), (0, 0)))
        e_flat = jnp.pad(e_flat, ((0, n_pad - N), (0, 0)))

    # Lane-padded per-step VMEM estimate (inputs/outputs double-buffered,
    # resident weights, f32 intermediates).  Only raise the scoped limit when
    # needed; cap at 48 MiB (v7x has 64 MiB physical per TensorCore).
    step_bytes = (2 * tm * _pad128(S * Hi) * in_bytes
                  + 2 * tm * _pad128(Hm) * in_bytes
                  + 2 * tm * _pad128(S) * out_bytes
                  + 4 * tm * _pad128(S * O) * 4
                  + (Hm + S * Hi + 8) * _pad128(S * O) * max(in_bytes, 4)
                  + (S * O) * _pad128(S) * 4)
    vmem_kwargs = {}
    if step_bytes > (12 << 20):
        vmem_kwargs["vmem_limit_bytes"] = int(min(step_bytes + (8 << 20), 48 << 20))

    out = pl.pallas_call(
        _attention_kernel,
        out_shape=jax.ShapeDtypeStruct((n_pad, S), out_dtype),
        grid_spec=pltpu.PrefetchScalarGridSpec(
            num_scalar_prefetch=0,
            grid=(n_blocks,),
            in_specs=[
                pl.BlockSpec((tm, Hm), lambda i: (i, 0)),
                pl.BlockSpec((tm, S * Hi), lambda i: (i, 0)),
                pl.BlockSpec((Hm, S * O), lambda i: (0, 0)),
                pl.BlockSpec((S * Hi, S * O), lambda i: (0, 0)),
                pl.BlockSpec((1, S * O), lambda i: (0, 0)),
                pl.BlockSpec((S * O, S), lambda i: (0, 0)),
            ],
            out_specs=pl.BlockSpec((tm, S), lambda i: (i, 0)),
        ),
        compiler_params=pltpu.CompilerParams(
            dimension_semantics=("parallel",), **vmem_kwargs),
    )(h_flat, e_flat, wh_tiled, webd, b_tiled, vsel)

    return out[:N].reshape(B, T, S)


def attention_reference(hidden, encoder_outputs, w_attn, b_attn, w_v):
    """Pure-JAX reference mirroring the torch forward exactly (f32)."""
    B, T, Hm = hidden.shape
    S = encoder_outputs.shape[2]
    h_rep = jnp.broadcast_to(hidden[:, :, None, :], (B, T, S, Hm))
    cat = jnp.concatenate([h_rep, encoder_outputs], axis=-1)
    energy = jnp.tanh(jnp.einsum("btsf,of->btso", cat, w_attn) + b_attn)
    attention = jnp.einsum("btso,o->bts", energy, w_v[0])
    return jax.nn.softmax(attention, axis=-1)


def _check(hidden, encoder_outputs, w_attn, b_attn, w_v, *,
           tol_match, tol_sum=1e-5, compute_dtype=None):
    out = attention_forward(hidden, encoder_outputs, w_attn, b_attn, w_v,
                            compute_dtype=compute_dtype)
    out = jax.block_until_ready(out)
    ref = attention_reference(hidden, encoder_outputs, w_attn, b_attn, w_v)
    B, T, S = ref.shape
    assert out.shape == (B, T, S)
    assert jnp.allclose(out, ref, atol=tol_match, rtol=tol_match), "mismatch vs reference"
    # Exact softmax normalizer -> rows sum to 1 to f32 precision.
    assert jnp.allclose(jnp.sum(out.astype(jnp.float32), axis=-1),
                        jnp.ones((B, T)), atol=tol_sum), "rows do not sum to 1"


if __name__ == "__main__":
    key = jax.random.PRNGKey(0)
    k_h, k_e, k_w, k_b, k_v = jax.random.split(key, 5)

    # Small shapes consistent with the module's forward:
    #   Attention(input_dim=16, output_dim=32, model_size=32)
    B, T, S = 2, 64, 8
    input_dim, model_size, output_dim = 16, 32, 32

    hidden = jax.random.normal(k_h, (B, T, model_size), dtype=jnp.float32)
    encoder_outputs = jax.random.normal(k_e, (B, T, S, input_dim), dtype=jnp.float32)

    # Deterministic parameter init (torch nn.Linear layouts).
    w_attn = 0.1 * jax.random.normal(k_w, (output_dim, model_size + input_dim),
                                     dtype=jnp.float32)                      # attn.weight [O, in]
    b_attn = 0.1 * jax.random.normal(k_b, (output_dim,), dtype=jnp.float32)  # attn.bias
    w_v = 0.1 * jax.random.normal(k_v, (1, output_dim), dtype=jnp.float32)   # v.weight

    # Main check (f32, default row tile -> 4 grid steps of 32 rows each).
    _check(hidden, encoder_outputs, w_attn, b_attn, w_v, tol_match=2e-3)

    # Ragged-row check (B*T not a multiple of the tile -> zero-pad path).
    _check(hidden[:, :5], encoder_outputs[:, :5], w_attn, b_attn, w_v, tol_match=2e-3)

    # bf16-input path (recommended on v6e/v7x: halves the encoder DMA,
    # doubles MXU rate); accumulation/softmax stay f32, so looser value
    # tolerance but the rows still sum to 1 exactly.
    _check(hidden, encoder_outputs, w_attn, b_attn, w_v,
           tol_match=3e-2, compute_dtype=jnp.bfloat16)

    print("KERNEL_OK")
</pallas_src>

<mosaic_0001>
module attributes {stable_mosaic.version = 11 : i64} {
  func.func @_attention_kernel(%arg0: i32, %arg1: memref<32x32xf32, #tpu.memory_space<vmem>>, %arg2: memref<32x128xf32, #tpu.memory_space<vmem>>, %arg3: memref<32x256xf32, #tpu.memory_space<vmem>>, %arg4: memref<128x256xf32, #tpu.memory_space<vmem>>, %arg5: memref<1x256xf32, #tpu.memory_space<vmem>>, %arg6: memref<256x8xf32, #tpu.memory_space<vmem>>, %arg7: memref<32x8xf32, #tpu.memory_space<vmem>>) attributes {dimension_semantics = [#tpu.dimension_semantics<parallel>], iteration_bounds = array<i64: 4>, scalar_prefetch = 0 : i64, scratch_operands = 0 : i64, tpu.core_type = #tpu.core_type<tc>, window_params = [{transform_indices = @transform_0, window_bounds = array<i64: 32, 32>}, {transform_indices = @transform_1, window_bounds = array<i64: 32, 128>}, {pipeline_mode = #tpu.pipeline_mode<synchronous>, transform_indices = @transform_2, window_bounds = array<i64: 32, 256>}, {pipeline_mode = #tpu.pipeline_mode<synchronous>, transform_indices = @transform_3, window_bounds = array<i64: 128, 256>}, {pipeline_mode = #tpu.pipeline_mode<synchronous>, transform_indices = @transform_4, window_bounds = array<i64: 1, 256>}, {pipeline_mode = #tpu.pipeline_mode<synchronous>, transform_indices = @transform_5, window_bounds = array<i64: 256, 8>}, {transform_indices = @transform_6, window_bounds = array<i64: 32, 8>}]} {
    %c0 = arith.constant 0 : index
    %c0_0 = arith.constant 0 : index
    %0 = vector.load %arg1[%c0, %c0_0] : memref<32x32xf32, #tpu.memory_space<vmem>>, vector<32x32xf32>
    %c0_1 = arith.constant 0 : index
    %c0_2 = arith.constant 0 : index
    %1 = vector.load %arg3[%c0_1, %c0_2] : memref<32x256xf32, #tpu.memory_space<vmem>>, vector<32x256xf32>
    %cst = arith.constant dense<0.000000e+00> : vector<32x256xf32>
    %2 = tpu.matmul %0, %1, %cst {dimension_numbers = #tpu.dot_dimension_numbers<[1], [0], [0], [1], [0, 0, 1, 1], [], []>} : vector<32x32xf32>, vector<32x256xf32>, vector<32x256xf32> -> vector<32x256xf32>
    %c0_3 = arith.constant 0 : index
    %c0_4 = arith.constant 0 : index
    %3 = vector.load %arg2[%c0_3, %c0_4] : memref<32x128xf32, #tpu.memory_space<vmem>>, vector<32x128xf32>
    %c0_5 = arith.constant 0 : index
    %c0_6 = arith.constant 0 : index
    %4 = vector.load %arg4[%c0_5, %c0_6] : memref<128x256xf32, #tpu.memory_space<vmem>>, vector<128x256xf32>
    %cst_7 = arith.constant dense<0.000000e+00> : vector<32x256xf32>
    %5 = tpu.matmul %3, %4, %cst_7 {dimension_numbers = #tpu.dot_dimension_numbers<[1], [0], [0], [1], [0, 0, 1, 1], [], []>} : vector<32x128xf32>, vector<128x256xf32>, vector<32x256xf32> -> vector<32x256xf32>
    %6 = arith.addf %5, %2 : vector<32x256xf32>
    %c0_8 = arith.constant 0 : index
    %c0_9 = arith.constant 0 : index
    %7 = vector.load %arg5[%c0_8, %c0_9] : memref<1x256xf32, #tpu.memory_space<vmem>>, vector<1x256xf32>
    %8 = vector.broadcast %7 : vector<1x256xf32> to vector<32x256xf32>
    %9 = arith.addf %6, %8 : vector<32x256xf32>
    %10 = math.tanh %9 : vector<32x256xf32>
    %c0_10 = arith.constant 0 : index
    %c0_11 = arith.constant 0 : index
    %11 = vector.load %arg6[%c0_10, %c0_11] : memref<256x8xf32, #tpu.memory_space<vmem>>, vector<256x8xf32>
    %cst_12 = arith.constant dense<0.000000e+00> : vector<32x8xf32>
    %12 = tpu.matmul %10, %11, %cst_12 {dimension_numbers = #tpu.dot_dimension_numbers<[1], [0], [0], [1], [0, 0, 1, 1], [], []>} : vector<32x256xf32>, vector<256x8xf32>, vector<32x8xf32> -> vector<32x8xf32>
    %cst_13 = arith.constant dense<0xFF800000> : vector<32xf32>
    %13 = vector.multi_reduction <maximumf>, %12, %cst_13 [1] : vector<32x8xf32> to vector<32xf32>
    %14 = vector.shape_cast %13 : vector<32xf32> to vector<32x1xf32>
    %15 = vector.broadcast %14 : vector<32x1xf32> to vector<32x8xf32>
    %16 = arith.subf %12, %15 : vector<32x8xf32>
    %17 = math.exp %16 : vector<32x8xf32>
    %cst_14 = arith.constant dense<0.000000e+00> : vector<32xf32>
    %18 = vector.multi_reduction <add>, %17, %cst_14 [1] : vector<32x8xf32> to vector<32xf32>
    %19 = vector.shape_cast %18 : vector<32xf32> to vector<32x1xf32>
    %20 = vector.broadcast %19 : vector<32x1xf32> to vector<32x8xf32>
    %21 = arith.divf %17, %20 : vector<32x8xf32>
    %c0_15 = arith.constant 0 : index
    %c0_16 = arith.constant 0 : index
    %22 = vector.load %arg7[%c0_15, %c0_16] : memref<32x8xf32, #tpu.memory_space<vmem>>, vector<32x8xf32>
    tpu.vector_store %arg7[%c0_15, %c0_16], %21 {strides = array<i32>} : memref<32x8xf32, #tpu.memory_space<vmem>>, vector<32x8xf32>,
    return
  }
  func.func @transform_0(%arg0: i32) -> (i32, i32) {
    %c0_i32 = arith.constant 0 : i32
    %c0_i32_0 = arith.constant 0 : i32
    return %arg0, %c0_i32 : i32, i32
  }
  func.func @transform_1(%arg0: i32) -> (i32, i32) {
    %c0_i32 = arith.constant 0 : i32
    %c0_i32_0 = arith.constant 0 : i32
    return %arg0, %c0_i32 : i32, i32
  }
  func.func @transform_2(%arg0: i32) -> (i32, i32) {
    %c0_i32 = arith.constant 0 : i32
    %c0_i32_0 = arith.constant 0 : i32
    %c0_i32_1 = arith.constant 0 : i32
    return %c0_i32, %c0_i32_0 : i32, i32
  }
  func.func @transform_3(%arg0: i32) -> (i32, i32) {
    %c0_i32 = arith.constant 0 : i32
    %c0_i32_0 = arith.constant 0 : i32
    %c0_i32_1 = arith.constant 0 : i32
    return %c0_i32, %c0_i32_0 : i32, i32
  }
  func.func @transform_4(%arg0: i32) -> (i32, i32) {
    %c0_i32 = arith.constant 0 : i32
    %c0_i32_0 = arith.constant 0 : i32
    %c0_i32_1 = arith.constant 0 : i32
    return %c0_i32, %c0_i32_0 : i32, i32
  }
  func.func @transform_5(%arg0: i32) -> (i32, i32) {
    %c0_i32 = arith.constant 0 : i32
    %c0_i32_0 = arith.constant 0 : i32
    %c0_i32_1 = arith.constant 0 : i32
    return %c0_i32, %c0_i32_0 : i32, i32
  }
  func.func @transform_6(%arg0: i32) -> (i32, i32) {
    %c0_i32 = arith.constant 0 : i32
    %c0_i32_0 = arith.constant 0 : i32
    return %arg0, %c0_i32 : i32, i32
  }
}

</mosaic_0001>

<bundles_post_ra>
// kernel: tpu_custom_call.1
= control target key start
LH: loop header
LB: loop body
LE: loop exit
PB: predicated region body
PF: predicated region fallthrough
CT: control target
= control target key end

     0   :  { %11 = vsyncpa [#allocation3], 0  ;;  %s999_s21 = smov 0   ;;  %s1270_s0 = inlined_call_operand.vmem [shape: f32[128,32], index: 0, kind: input, shape index: {}]   ;;  %s1271_s1 = inlined_call_operand.vmem [shape: f32[128,128], index: 1, kind: input, shape index: {}]   ;;  %s1272_s2 = inlined_call_operand.hbm [shape: f32[32,256], index: 2, kind: input, shape index: {}]   ;;  %s1273_s3 = inlined_call_operand.vmem [shape: f32[128,256], index: 3, kind: input, shape index: {}]   ;;  %s1274_s4 = inlined_call_operand.vmem [shape: f32[1,256], index: 4, kind: input, shape index: {}]   ;;  %s1275_s5 = inlined_call_operand.vmem [shape: f32[256,8], index: 5, kind: input, shape index: {}]   ;;  %s1276_s6 = inlined_call_operand.vmem [shape: f32[128,8], index: 6, kind: output, shape index: {}]  }
   0x1 LB: > { %s805_s22 = sadd.s32 4294967295, %s958_s21   ;;  %p807_p0 = scmp.ge.s32.totalorder %s958_s21, 1  ;;  %s958_s21 = sphi %s999_s21, %s17_s21  }
   0x2   : > { %p184_p1 = scmp.lt.s32.totalorder %s958_s21, 5  ;;  %s960_s23 = smov [#allocation2]  }
   0x3   : > { %s196_s24 = sshll.u32 %s960_s23, 4  ;;  %p1011_p3 = scmp.eq.s32.totalorder %s805_s22, 0  ;;  %s197_s24 = int_to_ptr.vmem [resolvable:$true] %s196_s24 }
   0x4   : > { %p1007_p2 = pnand %p807_p0, %p184_p1  ;;  %s933_s27 = scalar_lea.vmem %s197_s24, 1024 }
   0x5   : > { %p934_p7 = scmp.ne.s32.totalorder %s197_s24, %s933_s27  ;;  %p941_p10 = scmp.lt.s32.totalorder %s197_s24, %s197_s24 }
   0x6   : > { %p872_p4 = pneg %p1007_p2  ;;  %p942_p11 = scmp.lt.s32.totalorder %s933_s27, %s933_s27 }
   0x8   : > { %p873_p5 = pnand %p1011_p3, %p872_p4  ;;  %p943_p12 = por %p942_p11, %p941_p10 }
   0xa   : > { %p924_p6 = pneg %p873_p5 }
   0xc   : > { %p936_p8 = pnand %p934_p7, %p924_p6 }
   0xe   : > { %p937_p9 = pneg %p936_p8 }
  0x10   : > { %p944_p13 = pnand %p943_p12, %p937_p9 }
  0x12   : > { %947 = shalt.err (!%p944_p13)
}
  0x13   : > { %s961_s28 = smov 256   ;;  %s962_s29 = smov 16  }
  0x14   : > { %875 = dma.hbm_to_vmem [thread:$0]  (!%p873_p5), %s1272_s2, 1024, %s197_s24, [#allocation3], %s961_s28, %s961_s28, %s962_s29  }
  0x15   : > { %239 = sbr.rel (%p1007_p2) target bundleno = 797 (0x31d), region = 44 }
  0x1a   : > { %953 = dma.done.wait (%p1011_p3), [#allocation3], 1024  }
  0x1b   : > { %955 = vsyncadd (%p1011_p3), [#allocation3], 4294966272  ;;  %v963_v0 = vmov 0.0   ;;  %s812_s8 = sshll.u32 %s805_s22, 2  ;;  %v441_v1 = vld [vmem:[%s1273_s3 + $0xf8] sm:$0xff]  ;;  %v440_v2 = vld [vmem:[%s1273_s3 + $0xf0] sm:$0xff] }
  0x1c   : > { %381 = vmatprep.mubr.f32.mxu0 %v963_v0  ;;  %506 = vmatprep.mubr.f32.mxu1 %v963_v0  ;;  %p275_p0 = scmp.lt.s32.totalorder %s812_s8, 15  ;;  %v439_v3 = vld [vmem:[%s1273_s3 + $0xe8] sm:$0xff]  ;;  %v438_v4 = vld [vmem:[%s1273_s3 + $0xe0] sm:$0xff]  ;;  %v437_v5 = vld [vmem:[%s1273_s3 + $0xd8] sm:$0xff]  ;;  %vm304_vm0 = vcmask 261120   ;;  %vm676_vm1 = vcmask 64512  }
  0x1d   : > { %442 = vmatprep.subr.mxu1 %v441_v1  ;;  %v436_v6 = vld [vmem:[%s1273_s3 + $0xd0] sm:$0xff]  ;;  %v435_v7 = vld [vmem:[%s1273_s3 + $0xc8] sm:$0xff]  ;;  %v434_v8 = vld [vmem:[%s1273_s3 + $0xc0] sm:$0xff] }
  0x1e   : > { %443 = vmatpush1.msra.mxu1 %v440_v2  ;;  %s1280_s8 = smov (!%p275_p0, %s812_s8), 15  ;;  %v433_v9 = vld [vmem:[%s1273_s3 + $0xb8] sm:$0xff]  ;;  %v432_v10 = vld [vmem:[%s1273_s3 + $0xb0] sm:$0xff]  ;;  %v431_v12 = vld [vmem:[%s1273_s3 + $0xa8] sm:$0xff] }
  0x1f   : > { %444 = vmatprep.subr.mxu1 %v439_v3  ;;  %v303_v11 = vld [vmem:[#allocation2 + $0x38] sm:$0xff]  ;;  %s1060_s30 = sshll.u32 %s1280_s8, 3  ;;  %v302_v13 = vld [vmem:[#allocation2 + $0x30] sm:$0xff]  ;;  %v301_v14 = vld [vmem:[#allocation2 + $0x28] sm:$0xff] }
  0x20   : > { %445 = vmatpush1.msra.mxu1 %v438_v4  ;;  %341 = vmatprep.subr.mxu0 %v303_v11  ;;  %v430_v15 = vld [vmem:[%s1273_s3 + $0xa0] sm:$0xff]  ;;  %v429_v17 = vld [vmem:[%s1273_s3 + $0x98] sm:$0xff]  ;;  %v298_v19 = vld [vmem:[#allocation2 + $0x10] sm:$0xff]  ;;  %s1075_s15 = scalar_lea.vmem %s1270_s0, %s1060_s30  ;;  %s284_s25 = scalar_lea.vmem %s1271_s1, %s1060_s30 }
  0x21   : > { %446 = vmatprep.subr.mxu1 %v437_v5  ;;  %342 = vmatpush1.msra.mxu0 %v302_v13  ;;  %v300_v16 = vld [vmem:[#allocation2 + $0x20] sm:$0xff]  ;;  %v299_v18 = vld [vmem:[#allocation2 + $0x18] sm:$0xff]  ;;  %v428_v20 = vld [vmem:[%s1273_s3 + $0x90] sm:$0xff]  ;;  %s290_s17 = scalar_lea.vmem %s1276_s6, %s1060_s30 }
  0x22   : > { %447 = vmatpush1.msra.mxu1 %v436_v6  ;;  %343 = vmatprep.subr.mxu0 %v301_v14  ;;  %v297_v21 = vld [vmem:[#allocation2 + $0x8] sm:$0xff]  ;;  %v296_v23 = vld [vmem:[#allocation2] sm:$0xff]  ;;  %v425_v26 = vld [vmem:[%s1273_s3 + $0x78] sm:$0xff] }
  0x23   : > { %448 = vmatprep.subr.mxu1 %v435_v7  ;;  %344 = vmatpush1.msra.mxu0 %v300_v16  ;;  %v427_v22 = vld [vmem:[%s1273_s3 + $0x88] sm:$0xff]  ;;  %v426_v24 = vld [vmem:[%s1273_s3 + $0x80] sm:$0xff]  ;;  %v424_v27 = vld [vmem:[%s1273_s3 + $0x70] sm:$0xff] }
  0x24   : > { %449 = vmatpush1.msra.mxu1 %v434_v8  ;;  %345 = vmatprep.subr.mxu0 %v299_v18  ;;  %v292_v25 = vld [vmem:[%s1075_s15] sm:$0xff]  ;;  %v423_v28 = vld [vmem:[%s1273_s3 + $0x68] sm:$0xff]  ;;  %v590_v29 = vld [vmem:[%s1275_s5 + $0xf8] sm:$0xff]  ;;  %v533_v18 = vlaneseq }
  0x25   : > { %450 = vmatprep.subr.mxu1 %v433_v9  ;;  %346 = vmatpush1.msra.mxu0 %v298_v19  ;;  %v574_v30 = vld [vmem:[%s1275_s5 + $0x78] sm:$0xff]  ;;  %v422_v31 = vld [vmem:[%s1273_s3 + $0x60] sm:$0xff]  ;;  %v293_v32 = vld [vmem:[%s1075_s15 + $0x8] sm:$0xff] }
  0x26   : > { %451 = vmatpush1.msra.mxu1 %v432_v10  ;;  %347 = vmatprep.subr.mxu0 %v297_v21  ;;  %v421_v33 = vld [vmem:[%s1273_s3 + $0x58] sm:$0xff]  ;;  %v420_v34 = vld [vmem:[%s1273_s3 + $0x50] sm:$0xff]  ;;  %v419_v36 = vld [vmem:[%s1273_s3 + $0x48] sm:$0xff] }
  0x27   : > { %452 = vmatprep.subr.mxu1 %v431_v12  ;;  %348 = vmatpush1.msra.mxu0 %v296_v23  ;;  %v589_v35 = vld [vmem:[%s1275_s5 + $0xf0] sm:$0xff]  ;;  %v418_v38 = vld [vmem:[%s1273_s3 + $0x40] sm:$0xff]  ;;  %v417_v40 = vld [vmem:[%s1273_s3 + $0x38] sm:$0xff] }
  0x28   : > { %453 = vmatpush1.msra.mxu1 %v430_v15  ;;  %818 = vmatmul.mubr.msk.f32.vlgmr.msra.gmra.mxu0 %vm304_vm0, %v292_v25  ;;  %v573_v37 = vld [vmem:[%s1275_s5 + $0x70] sm:$0xff]  ;;  %v588_v42 = vld [vmem:[%s1275_s5 + $0xe8] sm:$0xff]  ;;  %v414_v45 = vld [vmem:[%s1273_s3 + $0x20] sm:$0xff] }
  0x29   : > { %454 = vmatprep.subr.mxu1 %v429_v17  ;;  %387 = vmatprep.mubr.f32.mxu0 %v963_v0  ;;  %v294_v39 = vld [vmem:[%s1075_s15 + $0x10] sm:$0xff]  ;;  %v415_v43 = vld [vmem:[%s1273_s3 + $0x28] sm:$0xff]  ;;  %v295_v46 = vld [vmem:[%s1075_s15 + $0x18] sm:$0xff] }
  0x2a   : > { %455 = vmatpush1.msra.mxu1 %v428_v20  ;;  %824 = vmatprep.subr.mxu0 %v590_v29  ;;  %v416_v41 = vld [vmem:[%s1273_s3 + $0x30] sm:$0xff]  ;;  %v572_v44 = vld [vmem:[%s1275_s5 + $0x68] sm:$0xff]  ;;  %v413_v47 = vld [vmem:[%s1273_s3 + $0x18] sm:$0xff]  ;;  %v534_v20 = vshrl.u32 %v533_v18, 7 }
  0x2b   : > { %456 = vmatprep.subr.mxu1 %v427_v22  ;;  %825 = vmatpush3.msra.mxu0 %v574_v30  ;;  %v587_v48 = vld [vmem:[%s1275_s5 + $0xe0] sm:$0xff]  ;;  %v412_v49 = vld [vmem:[%s1273_s3 + $0x10] sm:$0xff]  ;;  %v411_v51 = vld [vmem:[%s1273_s3 + $0x8] sm:$0xff] }
  0x2c   : > { %457 = vmatpush1.msra.mxu1 %v426_v24  ;;  %819 = vmatmul.mubr.msk.f32.gmra.mxu0 %vm304_vm0, %v293_v32  ;;  %v571_v50 = vld [vmem:[%s1275_s5 + $0x60] sm:$0xff]  ;;  %v407_v54 = vld [vmem:[%s284_s25 + $0x8] sm:$0xff]  ;;  %v408_v55 = vld [vmem:[%s284_s25 + $0x10] sm:$0xff]  ;;  %v535_v22 = vsub.s32 0, %v534_v20  ;;  %v539_v24 = vsub.s32 1, %v534_v20 }
  0x2d   : > { %458 = vmatprep.subr.mxu1 %v425_v26  ;;  %393 = vmatprep.mubr.f32.mxu0 %v963_v0  ;;  %v410_v52 = vld [vmem:[%s1273_s3] sm:$0xff]  ;;  %v409_v56 = vld [vmem:[%s284_s25 + $0x18] sm:$0xff]  ;;  %v585_v59 = vld [vmem:[%s1275_s5 + $0xd0] sm:$0xff] }
  0x2e   : > { %459 = vmatpush1.msra.mxu1 %v424_v27  ;;  %826 = vmatprep.subr.mxu0 %v589_v35  ;;  %v406_v53 = vld [vmem:[%s284_s25] sm:$0xff]  ;;  %v586_v57 = vld [vmem:[%s1275_s5 + $0xd8] sm:$0xff]  ;;  %v569_v60 = vld [vmem:[%s1275_s5 + $0x50] sm:$0xff] }
  0x2f   : > { %460 = vmatprep.subr.mxu1 %v423_v28  ;;  %827 = vmatpush3.msra.mxu0 %v573_v37  ;;  %v570_v58 = vld [vmem:[%s1275_s5 + $0x58] sm:$0xff]  ;;  %v584_v61 = vld [vmem:[%s1275_s5 + $0xc8] sm:$0xff]  ;;  %v583_v63 = vld [vmem:[%s1275_s5 + $0xc0] sm:$0xff] }
  0x30   : > { %461 = vmatpush1.msra.mxu1 %v422_v31  ;;  %820 = vmatmul.mubr.msk.f32.gmra.mxu0 %vm304_vm0, %v294_v39  ;;  %v568_v62 = vld [vmem:[%s1275_s5 + $0x48] sm:$0xff]  ;;  %v582_v1 = vld [vmem:[%s1275_s5 + $0xb8] sm:$0xff]  ;;  %v581_v3 = vld [vmem:[%s1275_s5 + $0xb0] sm:$0xff] }
  0x31   : > { %462 = vmatprep.subr.mxu1 %v421_v33  ;;  %399 = vmatprep.mubr.f32.mxu0 %v963_v0  ;;  %v566_v2 = vld [vmem:[%s1275_s5 + $0x38] sm:$0xff]  ;;  %v565_v4 = vld [vmem:[%s1275_s5 + $0x30] sm:$0xff]  ;;  %v580_v5 = vld [vmem:[%s1275_s5 + $0xa8] sm:$0xff] }
  0x32   : > { %463 = vmatpush1.msra.mxu1 %v420_v34  ;;  %828 = vmatprep.subr.mxu0 %v588_v42  ;;  %v564_v6 = vld [vmem:[%s1275_s5 + $0x28] sm:$0xff]  ;;  %v579_v7 = vld [vmem:[%s1275_s5 + $0xa0] sm:$0xff]  ;;  %v578_v9 = vld [vmem:[%s1275_s5 + $0x98] sm:$0xff] }
  0x33   : > { %464 = vmatprep.subr.mxu1 %v419_v36  ;;  %829 = vmatpush3.msra.mxu0 %v572_v44  ;;  %v563_v8 = vld [vmem:[%s1275_s5 + $0x20] sm:$0xff]  ;;  %v562_v10 = vld [vmem:[%s1275_s5 + $0x18] sm:$0xff]  ;;  %v577_v11 = vld [vmem:[%s1275_s5 + $0x90] sm:$0xff] }
  0x34   : > { %465 = vmatpush1.msra.mxu1 %v418_v38  ;;  %821 = vmatmul.mubr.msk.f32.gmra.mxu0 %vm304_vm0, %v295_v46  ;;  %v561_v12 = vld [vmem:[%s1275_s5 + $0x10] sm:$0xff]  ;;  %v576_v13 = vld [vmem:[%s1275_s5 + $0x88] sm:$0xff]  ;;  %v575_v15 = vld [vmem:[%s1275_s5 + $0x80] sm:$0xff] }
  0x35   : > { %466 = vmatprep.subr.mxu1 %v417_v40  ;;  %830 = vmatprep.subr.mxu0 %v587_v48  ;;  %v560_v14 = vld [vmem:[%s1275_s5 + $0x8] sm:$0xff]  ;;  %v559_v16 = vld [vmem:[%s1275_s5] sm:$0xff] }
  0x36   : > { %467 = vmatpush1.msra.mxu1 %v416_v41  ;;  %831 = vmatpush3.msra.mxu0 %v571_v50  ;;  %v531_v23 = vld [vmem:[%s1274_s4] sm:$0x3] }
  0x37   : > { %468 = vmatprep.subr.mxu1 %v415_v43  ;;  %832 = vmatprep.subr.mxu0 %v586_v57  ;;  %v536_v27 = vrot.slane %v531_v23, %v535_v22  ;;  %v540_v29 = vrot.slane %v531_v23, %v539_v24 }
  0x38   : > { %469 = vmatpush1.msra.mxu1 %v414_v45  ;;  %833 = vmatpush3.msra.mxu0 %v570_v58 }
  0x39   : > { %470 = vmatprep.subr.mxu1 %v413_v47  ;;  %834 = vmatprep.subr.mxu0 %v585_v59 }
  0x3a   : > { %471 = vmatpush1.msra.mxu1 %v412_v49  ;;  %835 = vmatpush3.msra.mxu0 %v569_v60 }
  0x3b   : > { %472 = vmatprep.subr.mxu1 %v411_v51  ;;  %836 = vmatprep.subr.mxu0 %v584_v61 }
  0x3c   : > { %473 = vmatpush1.msra.mxu1 %v410_v52  ;;  %837 = vmatpush3.msra.mxu0 %v568_v62 }
  0x3d   : > { %507 = vmatmul.mubr.f32.vlgmr.msra.gmra.mxu1 %v406_v53  ;;  %838 = vmatprep.subr.mxu0 %v583_v63 }
  0x3e   : > { %512 = vmatprep.mubr.f32.mxu1 %v963_v0 }
  0x41   : > { %513 = vmatmul.mubr.f32.gmra.mxu1 %v407_v54 }
  0x42   : > { %518 = vmatprep.mubr.f32.mxu1 %v963_v0 }
  0x45   : > { %519 = vmatmul.mubr.f32.gmra.mxu1 %v408_v55 }
  0x46   : > { %524 = vmatprep.mubr.f32.mxu1 %v963_v0  ;;  %v567_v0 = vld [vmem:[%s1275_s5 + $0x40] sm:$0xff] }
  0x47   : > { %839 = vmatpush3.msra.mxu0 %v567_v0 }
  0x48   : > { %840 = vmatprep.subr.mxu0 %v582_v1 }
  0x49   : > { %525 = vmatmul.mubr.f32.gmra.mxu1 %v409_v56  ;;  %841 = vmatpush3.msra.mxu0 %v566_v2 }
  0x4a   : > { %842 = vmatprep.subr.mxu0 %v581_v3 }
  0x4b   : > { %843 = vmatpush3.msra.mxu0 %v565_v4 }
  0x4c   : > { %844 = vmatprep.subr.mxu0 %v580_v5 }
  0x4d   : > { %845 = vmatpush3.msra.mxu0 %v564_v6 }
  0x4e   : > { %846 = vmatprep.subr.mxu0 %v579_v7 }
  0x4f   : > { %847 = vmatpush3.msra.mxu0 %v563_v8 }
  0x50   : > { %848 = vmatprep.subr.mxu0 %v578_v9 }
  0x51   : > { %849 = vmatpush3.msra.mxu0 %v562_v10 }
  0x52   : > { %850 = vmatprep.subr.mxu0 %v577_v11 }
  0x53   : > { %851 = vmatpush3.msra.mxu0 %v561_v12 }
  0x54   : > { %852 = vmatprep.subr.mxu0 %v576_v13 }
  0x55   : > { %853 = vmatpush3.msra.mxu0 %v560_v14 }
  0x56   : > { %854 = vmatprep.subr.mxu0 %v575_v15 }
  0x57   : > { %855 = vmatpush3.msra.mxu0 %v559_v16 }
  0xe8   : > { %v383_v17 = vpop.f32.mrf.mxu0 }
  0xea   : > { %v385_v19 = vpop.f32.mrf.mxu0 }
  0xec   : > { %v389_v21 = vpop.f32.mrf.mxu0 }
  0xee   : > { %v391_v25 = vpop.f32.mrf.mxu0 }
  0xf0   : > { %v395_v31 = vpop.f32.mrf.mxu0 }
  0xf2   : > { %v397_v38 = vpop.f32.mrf.mxu0 }
  0xf4   : > { %v401_v44 = vpop.f32.mrf.mxu0 }
  0xf6   : > { %v403_v51 = vpop.f32.mrf.mxu0 }
  0xfd   : > { %v508_v26 = vpop.f32.mrf.mxu1 }
  0xfe   : > { %v509_v28 = vadd.f32 %v508_v26, %v383_v17 }
  0xff   : > { %v510_v30 = vpop.f32.mrf.mxu1 }
 0x100   : > { %v511_v32 = vadd.f32 %v510_v30, %v385_v19  ;;  %v543_v33 = vadd.f32 %v536_v27, %v509_v28 }
 0x101   : > { %v514_v34 = vpop.f32.mrf.mxu1 }
 0x102   : > { %v544_v35 = vadd.f32 %v540_v29, %v511_v32  ;;  %v515_v36 = vadd.f32 %v514_v34, %v389_v21 }
 0x103   : > { %v516_v37 = vpop.f32.mrf.mxu1 }
 0x104   : > { %890 = vtanh.f32 %v544_v35  ;;  %v517_v39 = vadd.f32 %v516_v37, %v391_v25  ;;  %v545_v40 = vadd.f32 %v536_v27, %v515_v36 }
 0x105   : > { %892 = vtanh.f32 %v543_v33  ;;  %v520_v41 = vpop.f32.mrf.mxu1 }
 0x106   : > { %v546_v42 = vadd.f32 %v540_v29, %v517_v39  ;;  %v521_v43 = vadd.f32 %v520_v41, %v395_v31 }
 0x107   : > { %v522_v45 = vpop.f32.mrf.mxu1 }
 0x108   : > { %894 = vtanh.f32 %v546_v42  ;;  %v523_v46 = vadd.f32 %v522_v45, %v397_v38  ;;  %v547_v47 = vadd.f32 %v536_v27, %v521_v43 }
 0x109   : > { %896 = vtanh.f32 %v545_v40  ;;  %v526_v48 = vpop.f32.mrf.mxu1 }
 0x10a   : > { %v548_v49 = vadd.f32 %v540_v29, %v523_v46  ;;  %v527_v50 = vadd.f32 %v526_v48, %v401_v44 }
 0x10b   : > { %v528_v52 = vpop.f32.mrf.mxu1 }
 0x10c   : > { %898 = vtanh.f32 %v548_v49  ;;  %v529_v53 = vadd.f32 %v528_v52, %v403_v51  ;;  %v549_v54 = vadd.f32 %v536_v27, %v527_v50 }
 0x10d   : > { %900 = vtanh.f32 %v547_v47 }
 0x10e   : > { %v550_v55 = vadd.f32 %v540_v29, %v529_v53 }
 0x110   : > { %902 = vtanh.f32 %v550_v55 }
 0x111   : > { %v891_v56 = vpop.eup %890  ;;  %904 = vtanh.f32 %v549_v54 }
 0x112   : > { %v893_v57 = vpop.eup %892  ;;  %655 = vmatprep.mubr.f32.mxu0 %v891_v56 }
 0x113   : > { %656 = vmatmul.mubr.f32.vlgmr.msra.gmra.mxu0 %v893_v57 }
 0x115   : > { %v895_v58 = vpop.eup %894 }
 0x116   : > { %v897_v59 = vpop.eup %896  ;;  %660 = vmatprep.mubr.f32.mxu0 %v895_v58 }
 0x117   : > { %661 = vmatmul.mubr.f32.gmra.mxu0 %v897_v59 }
 0x119   : > { %v899_v60 = vpop.eup %898 }
 0x11a   : > { %v901_v61 = vpop.eup %900  ;;  %665 = vmatprep.mubr.f32.mxu0 %v899_v60 }
 0x11b   : > { %666 = vmatmul.mubr.f32.gmra.mxu0 %v901_v61 }
 0x11d   : > { %v903_v62 = vpop.eup %902 }
 0x11e   : > { %v905_v63 = vpop.eup %904  ;;  %670 = vmatprep.mubr.f32.mxu0 %v903_v62 }
 0x11f   : > { %671 = vmatmul.mubr.f32.gmra.mxu0 %v905_v63 }
 0x1d3   : > { %v856_v0 = vpop.f32.mrf.mxu0 }
 0x1d5   : > { %v857_v1 = vpop.f32.mrf.mxu0 }
 0x1d6   : > { %v858_v2 = vadd.f32 %v857_v1, %v856_v0 }
 0x1d7   : > { %v859_v3 = vpop.f32.mrf.mxu0 }
 0x1d8   : > { %v677_v4 = vsel %vm676_vm1, %v858_v2, -inf }
 0x1d9   : > { %v860_v5 = vpop.f32.mrf.mxu0  ;;  %678 = vmax.xlane.f32.xlu0 %v677_v4 }
 0x1da   : > { %v861_v6 = vadd.f32 %v860_v5, %v859_v3 }
 0x1db   : > { %v862_v7 = vpop.f32.mrf.mxu0 }
 0x1dc   : > { %v680_v8 = vsel %vm676_vm1, %v861_v6, -inf }
 0x1dd   : > { %v863_v9 = vpop.f32.mrf.mxu0  ;;  %681 = vmax.xlane.f32.xlu0 %v680_v8 }
 0x1de   : > { %v864_v10 = vadd.f32 %v863_v9, %v862_v7 }
 0x1df   : > { %v865_v11 = vpop.f32.mrf.mxu0 }
 0x1e0   : > { %v683_v12 = vsel %vm676_vm1, %v864_v10, -inf }
 0x1e1   : > { %684 = vmax.xlane.f32.xlu1 %v683_v12  ;;  %v866_v13 = vpop.f32.mrf.mxu0 }
 0x1e2   : > { %v867_v14 = vadd.f32 %v866_v13, %v865_v11 }
 0x1e4   : > { %v686_v15 = vsel %vm676_vm1, %v867_v14, -inf }
 0x1e5   : > { %687 = vmax.xlane.f32.xlu1 %v686_v15 }
 0x262   : > { %v679_v16 = vpop.xlane.xlu0 %678 }
 0x263   : > { %v689_v17 = vsub.f32 %v858_v2, %v679_v16 }
 0x265   : > { %v693_v18 = vmul.f32 1.442695, %v689_v17 }
 0x266   : > { %v682_v19 = vpop.xlane.xlu0 %681 }
 0x267   : > { %906 = vpow2.f32 %v693_v18  ;;  %v690_v20 = vsub.f32 %v861_v6, %v682_v19 }
 0x269   : > { %v695_v21 = vmul.f32 1.442695, %v690_v20 }
 0x26a   : > { %v685_v22 = vpop.xlane.xlu1 %684 }
 0x26b   : > { %908 = vpow2.f32 %v695_v21  ;;  %v691_v23 = vsub.f32 %v864_v10, %v685_v22 }
 0x26d   : > { %v697_v24 = vmul.f32 1.442695, %v691_v23 }
 0x26e   : > { %v688_v25 = vpop.xlane.xlu1 %687 }
 0x26f   : > { %910 = vpow2.f32 %v697_v24  ;;  %v692_v26 = vsub.f32 %v867_v14, %v688_v25 }
 0x271   : > { %v699_v27 = vmul.f32 1.442695, %v692_v26 }
 0x273   : > { %912 = vpow2.f32 %v699_v27 }
 0x274   : > { %v907_v28 = vpop.eup %906 }
 0x275   : > { %v701_v29 = vsel %vm676_vm1, %v907_v28, 0.0 }
 0x276   : > { %702 = vadd.xlane.f32.xlu0 %v701_v29 }
 0x278   : > { %v909_v30 = vpop.eup %908 }
 0x279   : > { %v704_v31 = vsel %vm676_vm1, %v909_v30, 0.0 }
 0x27a   : > { %705 = vadd.xlane.f32.xlu1 %v704_v31 }
 0x27c   : > { %v911_v32 = vpop.eup %910 }
 0x27d   : > { %v707_v33 = vsel %vm676_vm1, %v911_v32, 0.0 }
 0x27e   : > { %708 = vadd.xlane.f32.xlu0 %v707_v33 }
 0x280   : > { %v913_v34 = vpop.eup %912 }
 0x281   : > { %v710_v35 = vsel %vm676_vm1, %v913_v34, 0.0 }
 0x282   : > { %711 = vadd.xlane.f32.xlu1 %v710_v35 }
 0x2ff   : > { %v703_v36 = vpop.xlane.xlu0 %702 }
 0x300   : > { %914 = vrcp.f32 %v703_v36 }
 0x303   : > { %v706_v37 = vpop.xlane.xlu1 %705 }
 0x304   : > { %916 = vrcp.f32 %v706_v37 }
 0x307   : > { %v709_v38 = vpop.xlane.xlu0 %708 }
 0x308   : > { %918 = vrcp.f32 %v709_v38 }
 0x30b   : > { %v712_v39 = vpop.xlane.xlu1 %711 }
 0x30c   : > { %920 = vrcp.f32 %v712_v39 }
 0x30d   : > { %v915_v40 = vpop.eup %914 }
 0x30e   : > { %v714_v41 = vmul.f32 %v915_v40, %v907_v28 }
 0x310   : > { %721 = vst.msk [vmem:[%s290_s17] sm:$0xff] %vm676_vm1, %v714_v41 }
 0x311   : > { %v917_v42 = vpop.eup %916 }
 0x312   : > { %v716_v43 = vmul.f32 %v917_v42, %v909_v30 }
 0x314   : > { %722 = vst.msk [vmem:[%s290_s17 + $0x8] sm:$0xff] %vm676_vm1, %v716_v43 }
 0x315   : > { %v919_v44 = vpop.eup %918 }
 0x316   : > { %v718_v45 = vmul.f32 %v919_v44, %v911_v32 }
 0x318   : > { %723 = vst.msk [vmem:[%s290_s17 + $0x10] sm:$0xff] %vm676_vm1, %v718_v45 }
 0x319   : > { %v921_v46 = vpop.eup %920 }
 0x31a   : > { %v720_v47 = vmul.f32 %v921_v46, %v913_v34 }
 0x31c   : > { %724 = vst.msk [vmem:[%s290_s17 + $0x18] sm:$0xff] %vm676_vm1, %v720_v47 }
 0x31d PF: > { %s17_s21 = sadd.s32 1, %s958_s21  }
 0x31e   : > { %p14_p1 = scmp.ge.s32.totalorder %s17_s21, 6  }
 0x320   :  { %16 = sbr.rel (!%p14_p1) target bundleno = 1 (0x1), region = 82 }
 0x325   :  { %747 = vsyncpa [#allocation3], 1 }
 0x326   :  { %749 = vsyncpa [#allocation3 + $0x1], 1 }

</bundles_post_ra>
